<compile_context>
chip_gen: v7x
topology: tpu7x:2x2x1
jax: 0.10.0
libtpu: 0.0.40
codegen_flags: <defaults>
</compile_context>

<pallas_src>
import math

import jax
import jax.numpy as jnp
from jax.experimental import pallas as pl
from jax.experimental.pallas import tpu as pltpu


def _round_up(x, m):
    return ((x + m - 1) // m) * m


def _make_kernel(pack):
    """EntryEncoder forward on one row tile in the lane-packed layout."""

    def kernel(vals_ref, pos_ref, w1v_ref, w1p_ref, b1_ref, w2_ref, b2_ref,
               out_ref):
        vals = vals_ref[...].astype(jnp.float32)   # [R, pack]
        pos = pos_ref[...].astype(jnp.float32)     # [R, pack*2F]

        # Layer 1: concat([values, pos]) @ W1 + b1 with W1 split (no concat).
        if pack == 1:
            # K=1 matmul would waste the MXU; broadcast-multiply on the VPU.
            hv = vals * w1v_ref[...]                               # [R,1]*[1,H]
        else:
            hv = jnp.dot(vals, w1v_ref[...],
                         preferred_element_type=jnp.float32)       # K = pack
        h1 = hv + jnp.dot(pos, w1p_ref[...],
                          preferred_element_type=jnp.float32)      # MXU
        h1 = h1 + b1_ref[...]
        h1 = h1 * jax.nn.sigmoid(h1)                               # Swish

        # Layer 2
        out = jnp.dot(h1, w2_ref[...],
                      preferred_element_type=jnp.float32) + b2_ref[...]
        out_ref[...] = out.astype(out_ref.dtype)

    return kernel


def _pick_pack(n_rows, two_f, hidden, out_dim):
    """How many logical rows share one 128-lane group."""
    widest = max(two_f, hidden, out_dim, 1)
    for p in (8, 4, 2, 1):
        if p * widest <= 128 and n_rows % p == 0:
            return p
    return 1


def _pick_tile(packed_rows, max_tile):
    if packed_rows <= 8:
        return packed_rows                 # single full-extent block
    # Keep >=2 grid steps so both v7x TensorCores get work on the "parallel"
    # axis; harmless on single-core v5e/v6e.
    cap = _round_up((packed_rows + 1) // 2, 8)
    return max(8, min(max_tile, cap))


def entry_encoder(values, pos_features, params, *, row_tile=16384):
    """values: [..., 1], pos_features: [..., 2F] -> [..., O].

    `row_tile` is the maximum number of logical rows processed per grid step.
    """
    w1v, w1p, b1, w2, b2 = params
    lead = values.shape[:-1]
    assert pos_features.shape[:-1] == lead
    assert values.shape[-1] == 1

    two_f = pos_features.shape[-1]
    hidden = w1p.shape[1]
    out_dim = w2.shape[1]
    n_rows = math.prod(lead) if lead else 1

    # Lane-dense packing factor.
    pack = _pick_pack(n_rows, two_f, hidden, out_dim)
    packed_rows = n_rows // pack

    # Free, contiguous reshapes — no pad / astype passes over HBM.
    vals_p = values.reshape(packed_rows, pack)
    pos_p = pos_features.reshape(packed_rows, pack * two_f)

    # Block-diagonal / lane-tiled parameters (tiny; hoist out of the call if
    # this runs in a hot loop).
    eye_p = jnp.eye(pack, dtype=w1p.dtype)
    w1v_blk = jnp.kron(eye_p, w1v)          # [pack,       pack*H]
    w1p_blk = jnp.kron(eye_p, w1p)          # [pack*2F,    pack*H]
    w2_blk = jnp.kron(eye_p, w2)            # [pack*H,     pack*O]
    b1_blk = jnp.tile(b1, (1, pack))        # [1,          pack*H]
    b2_blk = jnp.tile(b2, (1, pack))        # [1,          pack*O]

    tile = _pick_tile(packed_rows, max(row_tile // pack, 8))
    grid = (pl.cdiv(packed_rows, tile),)    # ragged last block: reads padded,
                                            # out-of-bounds writes dropped.

    full = lambda i: (0, 0)                 # resident parameter blocks

    out_packed = pl.pallas_call(
        _make_kernel(pack),
        out_shape=jax.ShapeDtypeStruct((packed_rows, pack * out_dim),
                                       jnp.float32),
        grid_spec=pltpu.PrefetchScalarGridSpec(
            num_scalar_prefetch=0,
            grid=grid,
            in_specs=[
                pl.BlockSpec((tile, pack), lambda i: (i, 0)),          # values
                pl.BlockSpec((tile, pack * two_f), lambda i: (i, 0)),  # pos
                pl.BlockSpec((pack, pack * hidden), full),             # W1 vals
                pl.BlockSpec((pack * two_f, pack * hidden), full),     # W1 pos
                pl.BlockSpec((1, pack * hidden), full),                # b1
                pl.BlockSpec((pack * hidden, pack * out_dim), full),   # W2
                pl.BlockSpec((1, pack * out_dim), full),               # b2
            ],
            out_specs=pl.BlockSpec((tile, pack * out_dim), lambda i: (i, 0)),
        ),
        compiler_params=pltpu.CompilerParams(
            dimension_semantics=("parallel",),
            # <10 MiB actual double-buffered footprint at the largest default
            # tile; 32 MiB is safe on v5e/v6e (128 MiB) and v7x (64 MiB).
            vmem_limit_bytes=32 * 1024 * 1024,
        ),
    )(vals_p, pos_p, w1v_blk, w1p_blk, b1_blk, w2_blk, b2_blk)

    return out_packed.reshape(*lead, out_dim)


def init_params(key, fourier_dim, hidden_dim, output_dim):
    """nn.Linear-style init; W1 is split into [values col | pos part]."""
    in_dim = 1 + 2 * fourier_dim
    k1, k2 = jax.random.split(key)

    def lin(k, fan_in, fan_out):
        bound = 1.0 / math.sqrt(fan_in)
        kw, kb = jax.random.split(k)
        w = jax.random.uniform(kw, (fan_in, fan_out), jnp.float32, -bound, bound)
        b = jax.random.uniform(kb, (1, fan_out), jnp.float32, -bound, bound)
        return w, b

    w1, b1 = lin(k1, in_dim, hidden_dim)
    w2, b2 = lin(k2, hidden_dim, output_dim)

    w1v = w1[:1]   # [1, H]   weight row multiplying the scalar "values" feature
    w1p = w1[1:]   # [2F, H]  weights for the positional features
    return (w1v, w1p, b1, w2, b2)


def reference(values, pos_features, params):
    """Pure-JAX reference matching the PyTorch EntryEncoder forward."""
    w1v, w1p, b1, w2, b2 = params
    w1 = jnp.concatenate([w1v, w1p], axis=0)
    x = jnp.concatenate([values, pos_features], axis=-1)
    h = x @ w1 + b1[0]
    h = h * jax.nn.sigmoid(h)      # Swish
    return h @ w2 + b2[0]


if __name__ == "__main__":
    FOURIER, HIDDEN, OUT = 16, 32, 32   # input dim = 1 + 2*16 = 33

    key = jax.random.PRNGKey(0)
    k_vals, k_pos, k_params, k_vals2, k_pos2 = jax.random.split(key, 5)
    params = init_params(k_params, FOURIER, HIDDEN, OUT)

    # Test 1: small batch, divisible row count -> lane-packed path (pack=4).
    B, T = 2, 8
    values = jax.random.normal(k_vals, (B, T, 1), jnp.float32)
    pos_features = jax.random.normal(k_pos, (B, T, 2 * FOURIER), jnp.float32)
    out = jax.block_until_ready(entry_encoder(values, pos_features, params))
    ref = reference(values, pos_features, params)
    assert out.shape == (B, T, OUT)
    assert jnp.allclose(out, ref, atol=1e-4, rtol=1e-4), "mismatch (packed path)"

    # Test 2: odd row count -> pack=1 path with a ragged (masked) last block.
    B2, T2 = 3, 7
    values2 = jax.random.normal(k_vals2, (B2, T2, 1), jnp.float32)
    pos_features2 = jax.random.normal(k_pos2, (B2, T2, 2 * FOURIER), jnp.float32)
    out2 = jax.block_until_ready(entry_encoder(values2, pos_features2, params))
    ref2 = reference(values2, pos_features2, params)
    assert out2.shape == (B2, T2, OUT)
    assert jnp.allclose(out2, ref2, atol=1e-4, rtol=1e-4), "mismatch (ragged path)"

    print("KERNEL_OK")
</pallas_src>

<mosaic_0001>
module attributes {stable_mosaic.version = 11 : i64} {
  func.func @kernel(%arg0: i32, %arg1: memref<4x4xf32, #tpu.memory_space<vmem>>, %arg2: memref<4x128xf32, #tpu.memory_space<vmem>>, %arg3: memref<4x128xf32, #tpu.memory_space<vmem>>, %arg4: memref<128x128xf32, #tpu.memory_space<vmem>>, %arg5: memref<1x128xf32, #tpu.memory_space<vmem>>, %arg6: memref<128x128xf32, #tpu.memory_space<vmem>>, %arg7: memref<1x128xf32, #tpu.memory_space<vmem>>, %arg8: memref<4x128xf32, #tpu.memory_space<vmem>>) attributes {dimension_semantics = [#tpu.dimension_semantics<parallel>], iteration_bounds = array<i64: 1>, scalar_prefetch = 0 : i64, scratch_operands = 0 : i64, tpu.core_type = #tpu.core_type<tc>, window_params = [{transform_indices = @transform_0, window_bounds = array<i64: 4, 4>}, {transform_indices = @transform_1, window_bounds = array<i64: 4, 128>}, {pipeline_mode = #tpu.pipeline_mode<synchronous>, transform_indices = @transform_2, window_bounds = array<i64: 4, 128>}, {pipeline_mode = #tpu.pipeline_mode<synchronous>, transform_indices = @transform_3, window_bounds = array<i64: 128, 128>}, {pipeline_mode = #tpu.pipeline_mode<synchronous>, transform_indices = @transform_4, window_bounds = array<i64: 1, 128>}, {pipeline_mode = #tpu.pipeline_mode<synchronous>, transform_indices = @transform_5, window_bounds = array<i64: 128, 128>}, {pipeline_mode = #tpu.pipeline_mode<synchronous>, transform_indices = @transform_6, window_bounds = array<i64: 1, 128>}, {transform_indices = @transform_7, window_bounds = array<i64: 4, 128>}]} {
    %c0 = arith.constant 0 : index
    %c0_0 = arith.constant 0 : index
    %0 = vector.load %arg1[%c0, %c0_0] : memref<4x4xf32, #tpu.memory_space<vmem>>, vector<4x4xf32>
    %c0_1 = arith.constant 0 : index
    %c0_2 = arith.constant 0 : index
    %1 = vector.load %arg2[%c0_1, %c0_2] : memref<4x128xf32, #tpu.memory_space<vmem>>, vector<4x128xf32>
    %c0_3 = arith.constant 0 : index
    %c0_4 = arith.constant 0 : index
    %2 = vector.load %arg3[%c0_3, %c0_4] : memref<4x128xf32, #tpu.memory_space<vmem>>, vector<4x128xf32>
    %cst = arith.constant dense<0.000000e+00> : vector<4x128xf32>
    %3 = tpu.matmul %0, %2, %cst {dimension_numbers = #tpu.dot_dimension_numbers<[1], [0], [0], [1], [0, 0, 1, 1], [], []>} : vector<4x4xf32>, vector<4x128xf32>, vector<4x128xf32> -> vector<4x128xf32>
    %c0_5 = arith.constant 0 : index
    %c0_6 = arith.constant 0 : index
    %4 = vector.load %arg4[%c0_5, %c0_6] : memref<128x128xf32, #tpu.memory_space<vmem>>, vector<128x128xf32>
    %cst_7 = arith.constant dense<0.000000e+00> : vector<4x128xf32>
    %5 = tpu.matmul %1, %4, %cst_7 {dimension_numbers = #tpu.dot_dimension_numbers<[1], [0], [0], [1], [0, 0, 1, 1], [], []>} : vector<4x128xf32>, vector<128x128xf32>, vector<4x128xf32> -> vector<4x128xf32>
    %6 = arith.addf %3, %5 : vector<4x128xf32>
    %c0_8 = arith.constant 0 : index
    %c0_9 = arith.constant 0 : index
    %7 = vector.load %arg5[%c0_8, %c0_9] : memref<1x128xf32, #tpu.memory_space<vmem>>, vector<1x128xf32>
    %8 = vector.broadcast %7 : vector<1x128xf32> to vector<4x128xf32>
    %9 = arith.addf %6, %8 : vector<4x128xf32>
    %10 = arith.negf %9 : vector<4x128xf32>
    %11 = math.exp %10 : vector<4x128xf32>
    %cst_10 = arith.constant 1.000000e+00 : f32
    %12 = vector.broadcast %cst_10 : f32 to vector<4x128xf32>
    %13 = arith.addf %12, %11 : vector<4x128xf32>
    %14 = arith.divf %12, %13 : vector<4x128xf32>
    %15 = arith.mulf %9, %14 : vector<4x128xf32>
    %c0_11 = arith.constant 0 : index
    %c0_12 = arith.constant 0 : index
    %16 = vector.load %arg6[%c0_11, %c0_12] : memref<128x128xf32, #tpu.memory_space<vmem>>, vector<128x128xf32>
    %cst_13 = arith.constant dense<0.000000e+00> : vector<4x128xf32>
    %17 = tpu.matmul %15, %16, %cst_13 {dimension_numbers = #tpu.dot_dimension_numbers<[1], [0], [0], [1], [0, 0, 1, 1], [], []>} : vector<4x128xf32>, vector<128x128xf32>, vector<4x128xf32> -> vector<4x128xf32>
    %c0_14 = arith.constant 0 : index
    %c0_15 = arith.constant 0 : index
    %18 = vector.load %arg7[%c0_14, %c0_15] : memref<1x128xf32, #tpu.memory_space<vmem>>, vector<1x128xf32>
    %19 = vector.broadcast %18 : vector<1x128xf32> to vector<4x128xf32>
    %20 = arith.addf %17, %19 : vector<4x128xf32>
    %c0_16 = arith.constant 0 : index
    %c0_17 = arith.constant 0 : index
    %21 = vector.load %arg8[%c0_16, %c0_17] : memref<4x128xf32, #tpu.memory_space<vmem>>, vector<4x128xf32>
    tpu.vector_store %arg8[%c0_16, %c0_17], %20 {strides = array<i32>} : memref<4x128xf32, #tpu.memory_space<vmem>>, vector<4x128xf32>,
    return
  }
  func.func @transform_0(%arg0: i32) -> (i32, i32) {
    %c0_i32 = arith.constant 0 : i32
    %c0_i32_0 = arith.constant 0 : i32
    return %arg0, %c0_i32 : i32, i32
  }
  func.func @transform_1(%arg0: i32) -> (i32, i32) {
    %c0_i32 = arith.constant 0 : i32
    %c0_i32_0 = arith.constant 0 : i32
    return %arg0, %c0_i32 : i32, i32
  }
  func.func @transform_2(%arg0: i32) -> (i32, i32) {
    %c0_i32 = arith.constant 0 : i32
    %c0_i32_0 = arith.constant 0 : i32
    %c0_i32_1 = arith.constant 0 : i32
    return %c0_i32, %c0_i32_0 : i32, i32
  }
  func.func @transform_3(%arg0: i32) -> (i32, i32) {
    %c0_i32 = arith.constant 0 : i32
    %c0_i32_0 = arith.constant 0 : i32
    %c0_i32_1 = arith.constant 0 : i32
    return %c0_i32, %c0_i32_0 : i32, i32
  }
  func.func @transform_4(%arg0: i32) -> (i32, i32) {
    %c0_i32 = arith.constant 0 : i32
    %c0_i32_0 = arith.constant 0 : i32
    %c0_i32_1 = arith.constant 0 : i32
    return %c0_i32, %c0_i32_0 : i32, i32
  }
  func.func @transform_5(%arg0: i32) -> (i32, i32) {
    %c0_i32 = arith.constant 0 : i32
    %c0_i32_0 = arith.constant 0 : i32
    %c0_i32_1 = arith.constant 0 : i32
    return %c0_i32, %c0_i32_0 : i32, i32
  }
  func.func @transform_6(%arg0: i32) -> (i32, i32) {
    %c0_i32 = arith.constant 0 : i32
    %c0_i32_0 = arith.constant 0 : i32
    %c0_i32_1 = arith.constant 0 : i32
    return %c0_i32, %c0_i32_0 : i32, i32
  }
  func.func @transform_7(%arg0: i32) -> (i32, i32) {
    %c0_i32 = arith.constant 0 : i32
    %c0_i32_0 = arith.constant 0 : i32
    return %arg0, %c0_i32 : i32, i32
  }
}

</mosaic_0001>

<bundles_post_ra>
// kernel: tpu_custom_call.1
= control target key start
LH: loop header
LB: loop body
LE: loop exit
PB: predicated region body
PF: predicated region fallthrough
CT: control target
= control target key end

     0   :  { %12 = vsyncpa [#allocation3], 0  ;;  %s805_s0 = inlined_call_operand.hbm [shape: f32[4,4], index: 0, kind: input, shape index: {}]   ;;  %s806_s1 = inlined_call_operand.hbm [shape: f32[4,128], index: 1, kind: input, shape index: {}]   ;;  %s807_s2 = inlined_call_operand.vmem [shape: f32[4,128], index: 2, kind: input, shape index: {}]   ;;  %s808_s3 = inlined_call_operand.hbm [shape: f32[128,128], index: 3, kind: input, shape index: {}]   ;;  %s809_s4 = inlined_call_operand.vmem [shape: f32[1,128], index: 4, kind: input, shape index: {}]   ;;  %s810_s5 = inlined_call_operand.hbm [shape: f32[128,128], index: 5, kind: input, shape index: {}]   ;;  %s811_s6 = inlined_call_operand.vmem [shape: f32[1,128], index: 6, kind: input, shape index: {}]   ;;  %s812_s7 = inlined_call_operand.hbm [shape: f32[4,128], index: 7, kind: output, shape index: {}]  }
   0x1   :  { %13 = vsyncpa [#allocation6], 0 }
   0x2   :  { %14 = vsyncpa [#allocation9], 0 }
   0x3   :  { %15 = vsyncpa [#allocation4], 0  ;;  %s667_s24 = smov [#allocation5]   ;;  %s668_s26 = smov [#allocation2]  }
   0x4   :  { %s32_s25 = sshll.u32 %s667_s24, 4  ;;  %s22_s27 = sshll.u32 %s668_s26, 4  ;;  %s33_s25 = int_to_ptr.vmem [resolvable:$true] %s32_s25  ;;  %s23_s27 = int_to_ptr.vmem [resolvable:$true] %s22_s27 }
   0x5   :  { %s549_s30 = scalar_lea.hbm %s806_s1, 64 }
   0x6   :  { %p550_p0 = scmp.ne.s32.totalorder %s806_s1, %s549_s30  ;;  %p553_p1 = scmp.lt.u32.totalorder %s549_s30, %s806_s1 }
   0x8   :  { %p555_p2 = pnand %p553_p1, %p550_p0 }
   0xa   :  { %558 = shalt.err (!%p555_p2)
}
   0xb   :  { %s559_s12 = scalar_lea.vmem %s33_s25, 64  ;;  %p564_p4 = scmp.lt.s32.totalorder %s33_s25, %s33_s25 }
   0xc   :  { %p560_p3 = scmp.ne.s32.totalorder %s33_s25, %s559_s12  ;;  %p565_p5 = scmp.lt.s32.totalorder %s559_s12, %s559_s12 }
   0xe   :  { %p566_p6 = por %p565_p5, %p564_p4 }
  0x10   :  { %p567_p7 = pnand %p566_p6, %p560_p3 }
  0x12   :  { %570 = shalt.err (!%p567_p7)
}
  0x13   :  { %35 = dma.hbm_to_vmem [thread:$0]  %s806_s1, 64, %s33_s25, [#allocation6]  }
  0x14   :  { %s571_s17 = scalar_lea.hbm %s805_s0, 64 }
  0x15   :  { %p572_p8 = scmp.ne.s32.totalorder %s805_s0, %s571_s17  ;;  %p575_p9 = scmp.lt.u32.totalorder %s571_s17, %s805_s0 }
  0x17   :  { %p577_p10 = pnand %p575_p9, %p572_p8 }
  0x19   :  { %580 = shalt.err (!%p577_p10)
}
  0x1a   :  { %s581_s22 = scalar_lea.vmem %s23_s27, 64  ;;  %p586_p12 = scmp.lt.s32.totalorder %s23_s27, %s23_s27 }
  0x1b   :  { %p582_p11 = scmp.ne.s32.totalorder %s23_s27, %s581_s22  ;;  %p587_p13 = scmp.lt.s32.totalorder %s581_s22, %s581_s22 }
  0x1d   :  { %p588_p0 = por %p587_p13, %p586_p12 }
  0x1f   :  { %p589_p1 = pnand %p588_p0, %p582_p11 }
  0x21   :  { %592 = shalt.err (!%p589_p1)
}
  0x22   :  { %25 = dma.hbm_to_vmem [thread:$0]  %s805_s0, 64, %s23_s27, [#allocation3]  }
  0x23   :  { %s669_s24 = smov [#allocation7]   ;;  %s593_s29 = scalar_lea.hbm %s808_s3, 2048 }
  0x24   :  { %s43_s25 = sshll.u32 %s669_s24, 4  ;;  %p594_p2 = scmp.ne.s32.totalorder %s808_s3, %s593_s29  ;;  %s44_s25 = int_to_ptr.vmem [resolvable:$true] %s43_s25 }
  0x25   :  { %p597_p3 = scmp.lt.u32.totalorder %s593_s29, %s808_s3 }
  0x27   :  { %p599_p4 = pnand %p597_p3, %p594_p2 }
  0x29   :  { %602 = shalt.err (!%p599_p4)
}
  0x2a   :  { %s603_s11 = scalar_lea.vmem %s44_s25, 2048  ;;  %p608_p6 = scmp.lt.s32.totalorder %s44_s25, %s44_s25 }
  0x2b   :  { %p604_p5 = scmp.ne.s32.totalorder %s44_s25, %s603_s11  ;;  %p609_p7 = scmp.lt.s32.totalorder %s603_s11, %s603_s11 }
  0x2d   :  { %p610_p8 = por %p609_p7, %p608_p6 }
  0x2f   :  { %p611_p9 = pnand %p610_p8, %p604_p5 }
  0x31   :  { %614 = shalt.err (!%p611_p9)
}
  0x32   :  { %s670_s0 = smov 128   ;;  %s671_s27 = smov 8  }
  0x33   :  { %49 = dma.hbm_to_vmem [thread:$0]  %s808_s3, 2048, %s44_s25, [#allocation6], %s670_s0, %s670_s0, %s671_s27  }
  0x34   :  { %s672_s14 = smov [#allocation8]   ;;  %s615_s18 = scalar_lea.hbm %s810_s5, 2048 }
  0x35   :  { %s57_s15 = sshll.u32 %s672_s14, 4  ;;  %p616_p10 = scmp.ne.s32.totalorder %s810_s5, %s615_s18  ;;  %s58_s15 = int_to_ptr.vmem [resolvable:$true] %s57_s15 }
  0x36   :  { %p619_p11 = scmp.lt.u32.totalorder %s615_s18, %s810_s5 }
  0x38   :  { %p621_p12 = pnand %p619_p11, %p616_p10 }
  0x3a   :  { %624 = shalt.err (!%p621_p12)
}
  0x3b   :  { %s625_s1 = scalar_lea.vmem %s58_s15, 2048  ;;  %p630_p0 = scmp.lt.s32.totalorder %s58_s15, %s58_s15 }
  0x3c   :  { %p626_p13 = scmp.ne.s32.totalorder %s58_s15, %s625_s1  ;;  %p631_p1 = scmp.lt.s32.totalorder %s625_s1, %s625_s1 }
  0x3e   :  { %p632_p2 = por %p631_p1, %p630_p0 }
  0x40   :  { %p633_p3 = pnand %p632_p2, %p626_p13 }
  0x42   :  { %636 = shalt.err (!%p633_p3)
}
  0x43   :  { %63 = dma.hbm_to_vmem [thread:$0]  %s810_s5, 2048, %s58_s15, [#allocation9], %s670_s0, %s670_s0, %s671_s27  }
  0x44   :  { %659 = dma.done.wait [#allocation3], 64  }
  0x45   :  { %660 = vsyncadd [#allocation3], 4294967232 }
  0x46   :  { %661 = dma.done.wait [#allocation6], 2112  }
  0x47   :  { %662 = vsyncadd [#allocation6], 4294965184 }
  0x48   :  { %663 = dma.done.wait [#allocation9], 2048  }
  0x49   :  { %664 = vsyncadd [#allocation9], 4294965248  ;;  %v673_v0 = vmov 0.0|0.0   ;;  %v674_v1 = vmov 0.0   ;;  %vm675_vm0 = vmmov 0   ;;  %v81_v2 = vld [vmem:[#allocation7] sm:$0xff] }
  0x4a   :  { %487 = vmatprep.subr.bf16.mxu0 %v673_v0  ;;  %447 = vmatprep.subr.mxu1 %v674_v1  ;;  %v82_v3 = vld [vmem:[#allocation7 + $0x8] sm:$0xff]  ;;  %v83_v4 = vld [vmem:[#allocation7 + $0x10] sm:$0xff]  ;;  %v84_v6 = vld [vmem:[#allocation7 + $0x18] sm:$0xff]  ;;  %vm171_vm1 = vcmask 1043456   ;;  %vm167_vm2 = vcmask 31744   ;;  %s676_s29 = smov [#allocation10]  }
  0x4b   :  { %449 = vmatprep.mubr.msk.f32.mxu1 %vm675_vm0, %v674_v1  ;;  %444 = vmatprep.mubr.msk.f32.mxu0 %vm675_vm0, %v674_v1  ;;  %v488_v5 = vpack.c.bf16 %v82_v3, %v81_v2  ;;  %v491_v7 = vpack.c.bf16 %v84_v6, %v83_v4  ;;  %v85_v8 = vld [vmem:[#allocation7 + $0x20] sm:$0xff]  ;;  %v86_v9 = vld [vmem:[#allocation7 + $0x28] sm:$0xff]  ;;  %v80_v10 = vld [vmem:[%s807_s2] sm:$0xf]  ;;  %s360_s30 = sshll.u32 %s676_s29, 4  ;;  %s361_s30 = int_to_ptr.vmem [resolvable:$true] %s360_s30 }
  0x4c   :  { %v78_v11 = vld [vmem:[#allocation2] sm:$0xf]  ;;  %448 = vmatpush3.msk.msra.mxu1 %vm171_vm1, %v80_v10  ;;  %v494_v12 = vpack.c.bf16 %v86_v9, %v85_v8  ;;  %v87_v13 = vld [vmem:[#allocation7 + $0x30] sm:$0xff]  ;;  %v89_v16 = vld [vmem:[#allocation7 + $0x40] sm:$0xff]  ;;  %p642_p5 = scmp.lt.s32.totalorder %s361_s30, %s361_s30 }
  0x4d   :  { %489 = vmatpush3.bf16.msra.mxu0 %v488_v5  ;;  %450 = vmatmul.mubr.msk.f32.vlgmr.msra.gmra.mrb[0].mxu1 %vm167_vm2, %v78_v11  ;;  %v88_v14 = vld [vmem:[#allocation7 + $0x38] sm:$0xff]  ;;  %v90_v17 = vld [vmem:[#allocation7 + $0x48] sm:$0xff]  ;;  %v91_v19 = vld [vmem:[#allocation7 + $0x50] sm:$0xff] }
  0x4e   :  { %490 = vmatprep.subr.bf16.mxu0 %v673_v0  ;;  %511 = vmatprep.subr.bf16.mxu1 %v673_v0  ;;  %v497_v15 = vpack.c.bf16 %v88_v14, %v87_v13  ;;  %v500_v18 = vpack.c.bf16 %v90_v17, %v89_v16  ;;  %v92_v20 = vld [vmem:[#allocation7 + $0x58] sm:$0xff]  ;;  %v93_v22 = vld [vmem:[#allocation7 + $0x60] sm:$0xff]  ;;  %v94_v23 = vld [vmem:[#allocation7 + $0x68] sm:$0xff] }
  0x4f   :  { %484 = vmatprep.mubr.msk.f32.mxu1 %vm675_vm0, %v674_v1  ;;  %v503_v21 = vpack.c.bf16 %v92_v20, %v91_v19  ;;  %v506_v24 = vpack.c.bf16 %v94_v23, %v93_v22  ;;  %v95_v25 = vld [vmem:[#allocation7 + $0x70] sm:$0xff]  ;;  %v96_v26 = vld [vmem:[#allocation7 + $0x78] sm:$0xff]  ;;  %v260_v29 = vld [vmem:[#allocation8] sm:$0xff] }
  0x50   :  { %v509_v27 = vpack.c.bf16 %v96_v26, %v95_v25  ;;  %v79_v28 = vld [vmem:[#allocation5] sm:$0xf]  ;;  %v261_v30 = vld [vmem:[#allocation8 + $0x8] sm:$0xff]  ;;  %v262_v32 = vld [vmem:[#allocation8 + $0x10] sm:$0xff] }
  0x51   :  { %492 = vmatpush3.bf16.msra.mxu0 %v491_v7  ;;  %v512_v31 = vpack.c.bf16 %v261_v30, %v260_v29  ;;  %v263_v33 = vld [vmem:[#allocation8 + $0x18] sm:$0xff]  ;;  %v264_v35 = vld [vmem:[#allocation8 + $0x20] sm:$0xff]  ;;  %v265_v36 = vld [vmem:[#allocation8 + $0x28] sm:$0xff] }
  0x52   :  { %493 = vmatprep.subr.bf16.mxu0 %v673_v0  ;;  %v515_v34 = vpack.c.bf16 %v263_v33, %v262_v32  ;;  %v518_v37 = vpack.c.bf16 %v265_v36, %v264_v35  ;;  %v266_v38 = vld [vmem:[#allocation8 + $0x30] sm:$0xff]  ;;  %v267_v39 = vld [vmem:[#allocation8 + $0x38] sm:$0xff]  ;;  %v268_v41 = vld [vmem:[#allocation8 + $0x40] sm:$0xff] }
  0x53   :  { %513 = vmatpush3.bf16.msra.mxu1 %v512_v31  ;;  %v521_v40 = vpack.c.bf16 %v267_v39, %v266_v38  ;;  %v269_v42 = vld [vmem:[#allocation8 + $0x48] sm:$0xff]  ;;  %v270_v44 = vld [vmem:[#allocation8 + $0x50] sm:$0xff]  ;;  %v271_v45 = vld [vmem:[#allocation8 + $0x58] sm:$0xff] }
  0x54   :  { %514 = vmatprep.subr.bf16.mxu1 %v673_v0  ;;  %v524_v43 = vpack.c.bf16 %v269_v42, %v268_v41  ;;  %v527_v46 = vpack.c.bf16 %v271_v45, %v270_v44  ;;  %v272_v47 = vld [vmem:[#allocation8 + $0x60] sm:$0xff]  ;;  %v273_v48 = vld [vmem:[#allocation8 + $0x68] sm:$0xff]  ;;  %v274_v50 = vld [vmem:[#allocation8 + $0x70] sm:$0xff] }
  0x55   :  { %495 = vmatpush3.bf16.msra.mxu0 %v494_v12  ;;  %v530_v49 = vpack.c.bf16 %v273_v48, %v272_v47  ;;  %v275_v51 = vld [vmem:[#allocation8 + $0x78] sm:$0xff] }
  0x56   :  { %496 = vmatprep.subr.bf16.mxu0 %v673_v0  ;;  %v533_v52 = vpack.c.bf16 %v275_v51, %v274_v50  ;;  %v373_v56 = vld [vmem:[%s809_s4] ss:$0 sm:$0xff]  ;;  %s637_s4 = scalar_lea.vmem %s361_s30, 64 }
  0x57   :  { %516 = vmatpush3.bf16.msra.mxu1 %v515_v34  ;;  %v375_v1 = vld [vmem:[%s811_s6] ss:$0 sm:$0xff]  ;;  %p638_p4 = scmp.ne.s32.totalorder %s361_s30, %s637_s4  ;;  %p643_p6 = scmp.lt.s32.totalorder %s637_s4, %s637_s4 }
  0x58   :  { %517 = vmatprep.subr.bf16.mxu1 %v673_v0 }
  0x59   :  { %498 = vmatpush3.bf16.msra.mxu0 %v497_v15  ;;  %p644_p7 = por %p643_p6, %p642_p5 }
  0x5a   :  { %499 = vmatprep.subr.bf16.mxu0 %v673_v0 }
  0x5b   :  { %519 = vmatpush3.bf16.msra.mxu1 %v518_v37  ;;  %p645_p8 = pnand %p644_p7, %p638_p4 }
  0x5c   :  { %520 = vmatprep.subr.bf16.mxu1 %v673_v0 }
  0x5d   :  { %501 = vmatpush3.bf16.msra.mxu0 %v500_v18 }
  0x5e   :  { %502 = vmatprep.subr.bf16.mxu0 %v673_v0 }
  0x5f   :  { %522 = vmatpush3.bf16.msra.mxu1 %v521_v40 }
  0x60   :  { %523 = vmatprep.subr.bf16.mxu1 %v673_v0 }
  0x61   :  { %504 = vmatpush3.bf16.msra.mxu0 %v503_v21 }
  0x62   :  { %505 = vmatprep.subr.bf16.mxu0 %v673_v0 }
  0x63   :  { %525 = vmatpush3.bf16.msra.mxu1 %v524_v43 }
  0x64   :  { %526 = vmatprep.subr.bf16.mxu1 %v673_v0 }
  0x65   :  { %507 = vmatpush3.bf16.msra.mxu0 %v506_v24 }
  0x66   :  { %508 = vmatprep.subr.bf16.mxu0 %v673_v0 }
  0x67   :  { %528 = vmatpush3.bf16.msra.mxu1 %v527_v46 }
  0x68   :  { %529 = vmatprep.subr.bf16.mxu1 %v673_v0 }
  0x69   :  { %510 = vmatpush3.bf16.msra.mxu0 %v509_v27 }
  0x6b   :  { %531 = vmatpush3.bf16.msra.mxu1 %v530_v49 }
  0x6c   :  { %445 = vmatmul.mubr.f32.vlgmr.msra.gmra.mrb[0].mxu0 %v79_v28  ;;  %532 = vmatprep.subr.bf16.mxu1 %v673_v0 }
  0x6f   :  { %534 = vmatpush3.bf16.msra.mxu1 %v533_v52 }
 0x120   :  { %v241_v53 = vpop.f32.mrb[0].mxu1 }
 0x121   :  { %v451_v54 = vpop.f32.mrb[1].mxu1 }
 0x13f   :  { %v163_v55 = vpop.f32.mrb[0].mxu0 }
 0x140   :  { %v242_v57 = vadd.f32 %v241_v53, %v163_v55  ;;  %v446_v58 = vpop.f32.mrb[1].mxu0 }
 0x142   :  { %v252_v59 = vadd.f32 %v373_v56, %v242_v57 }
 0x144   :  { %v374_v60 = vmul.f32 -1.442695, %v252_v59 }
 0x146   :  { %545 = vpow2.f32 %v374_v60 }
 0x150   :  { %v546_v61 = vpop.eup %545 }
 0x151   :  { %v256_v62 = vadd.f32 1.0, %v546_v61 }
 0x153   :  { %547 = vrcp.f32 %v256_v62 }
 0x15d   :  { %v548_v63 = vpop.eup %547 }
 0x15e   :  { %v259_v0 = vmul.f32 %v548_v63, %v252_v59 }
 0x160   :  { %485 = vmatmul.mubr.f32.vlgmr.msra.gmra.mrb[2].mxu1 %v259_v0 }
 0x233   :  { %v349_v2 = vpop.f32.mrb[2].mxu1 }
 0x234   :  { %v350_v3 = vadd.f32 %v375_v1, %v349_v2  ;;  %v486_v4 = vpop.f32.mrb[3].mxu1 }
 0x236   :  { %353 = vst [vmem:[#allocation10] sm:$0xf] %v350_v3 }
 0x237   :  { %648 = shalt.err (!%p645_p8)
}
 0x238   :  { %s649_s10 = scalar_lea.hbm %s812_s7, 64 }
 0x239   :  { %p650_p9 = scmp.ne.s32.totalorder %s812_s7, %s649_s10  ;;  %p653_p10 = scmp.lt.u32.totalorder %s649_s10, %s812_s7 }
 0x23b   :  { %p655_p11 = pnand %p653_p10, %p650_p9 }
 0x23d   :  { %658 = shalt.err (!%p655_p11)
}
 0x23e   :  { %363 = dma.vmem_to_hbm [thread:$0]  %s361_s30, 64, %s812_s7, [#allocation4]  }
 0x23f   :  { %665 = dma.done.wait [#allocation4], 64  }
 0x240   :  { %666 = vsyncadd [#allocation4], 4294967232 }
 0x241   :  { %367 = vsyncpa [#allocation3], 1 }
 0x242   :  { %368 = vsyncpa [#allocation6], 1 }
 0x243   :  { %369 = vsyncpa [#allocation9], 1 }
 0x244   :  { %370 = vsyncpa [#allocation4], 1 }

</bundles_post_ra>
